<compile_context>
chip_gen: v7x
topology: tpu7x:2x2x1
jax: 0.10.0
libtpu: 0.0.40
codegen_flags: <defaults>
</compile_context>

<pallas_src>
import jax
import jax.numpy as jnp
from jax.experimental import pallas as pl
from jax.experimental.pallas import tpu as pltpu


# ---------------------------------------------------------------------------
# Generation-aware tile / VMEM-limit selection
# ---------------------------------------------------------------------------
def _hw_config():
    tile_bytes = 2 * 1024 * 1024          # v7x-safe default (64 MiB VMEM / TC)
    vmem_limit = 40 * 1024 * 1024
    try:
        cap = pltpu.get_tpu_info().vmem_capacity_bytes
        if cap >= 128 * 1024 * 1024:      # v5e / v6e: room for bigger tiles
            tile_bytes = 4 * 1024 * 1024
            vmem_limit = 96 * 1024 * 1024
    except Exception:
        pass
    return tile_bytes, vmem_limit


# ---------------------------------------------------------------------------
# Layout: flatten row-major into a lane-dense [rows, lane] slab.
# Arbitrary sizes are handled by edge-padding the flat tensor (pad replicates
# the last element, so min/max are unaffected; padded outputs are discarded).
# ---------------------------------------------------------------------------
def _choose_layout(total, tile_bytes):
    lane = 1024 if total >= 1024 else 128
    rows = -(-total // lane)                                  # ceil
    max_rows = max(8, (tile_bytes // (4 * lane)) // 8 * 8)    # 8-aligned row cap
    if rows <= max_rows:
        tile_rows = rows                                      # single full-extent block
    else:
        tile_rows = max_rows
        rows = -(-rows // tile_rows) * tile_rows              # pad rows to tile multiple
    n_blocks = rows // tile_rows
    return rows * lane, rows, lane, tile_rows, n_blocks


def _prepare_input(x, tile_bytes):
    total = 1
    for s in x.shape:
        total *= s
    padded_total, rows, lane, tile_rows, n_blocks = _choose_layout(total, tile_bytes)
    flat = x.reshape(-1)
    if padded_total != total:
        flat = jnp.pad(flat, (0, padded_total - total), mode="edge")
    return flat.reshape(rows, lane), total, tile_rows, n_blocks


# ---------------------------------------------------------------------------
# Fused training kernel: phase 0 = global min/max + EMA + scale, phase 1 = quantize
# ---------------------------------------------------------------------------
def _fused_train_kernel(params_ref, x_ref, o_ref, cmin_ref, cmax_ref,
                        kmaxabs_ref, kscale_ref, min_acc, max_acc,
                        maxabs_sc, scale_sc):
    # params (SMEM, scalar-prefetched, f32):
    #   [0] momentum  [1] bias_corr = 1-(1-m)**step  [2] tracked_min_biased
    #   [3] tracked_max_biased  [4] n = 2^(num_bits-1)  [5] n_eff = n*(1-1e-4)
    #   [6] threshold  [7] zero_point (always 0 for symmetric quant)
    p = pl.program_id(0)
    i = pl.program_id(1)
    last = pl.num_programs(1) - 1

    @pl.when(p == 0)
    def _reduce_phase():
        @pl.when(i == 0)
        def _init():
            min_acc[...] = jnp.full(min_acc.shape, jnp.inf, min_acc.dtype)
            max_acc[...] = jnp.full(max_acc.shape, -jnp.inf, max_acc.dtype)

        x = x_ref[...].astype(jnp.float32)
        min_acc[...] = jnp.minimum(min_acc[...], x)      # pure VPU accumulation
        max_acc[...] = jnp.maximum(max_acc[...], x)

        @pl.when(i == last)
        def _finalize():
            cur_min = jnp.min(min_acc[...], keepdims=True)   # (1, 1)
            cur_max = jnp.max(max_acc[...], keepdims=True)   # (1, 1)
            m = params_ref[0]
            bias_corr = params_ref[1]
            tmin_b = params_ref[2] * (1.0 - m) + m * cur_min
            tmax_b = params_ref[3] * (1.0 - m) + m * cur_max
            tmin = tmin_b / bias_corr                        # unbiased EMA
            tmax = tmax_b / bias_corr
            max_abs = jnp.maximum(jnp.abs(tmin), jnp.abs(tmax))
            sat = jnp.where(max_abs == 0.0, params_ref[4], max_abs)
            scale = params_ref[5] / sat                      # n*(1-1e-4)/sat
            cmin_ref[...] = cur_min
            cmax_ref[...] = cur_max
            kmaxabs_ref[...] = max_abs
            kscale_ref[...] = scale
            maxabs_sc[...] = max_abs                         # cross-phase carry
            scale_sc[...] = scale

    @pl.when(p == 1)
    def _quant_phase():
        max_abs = maxabs_sc[...]          # (1,1), broadcasts over the tile
        scale = scale_sc[...]
        thr = params_ref[6]
        zp = params_ref[7]
        x = x_ref[...].astype(jnp.float32)
        xc = jnp.clip(x, -max_abs, max_abs)                  # torch.clamp
        q = jnp.trunc(scale * xc - zp)                       # torch.trunc
        q = jnp.where((q >= -thr) & (q <= thr), 0.0, q)      # spike window -> 0
        o_ref[...] = ((q + zp) / scale).astype(o_ref.dtype)  # divide (matches ref)


def _fused_forward(params, x2d, tile_rows, n_blocks, vmem_limit):
    R, L = x2d.shape
    out_shapes = (
        jax.ShapeDtypeStruct((R, L), x2d.dtype),
        jax.ShapeDtypeStruct((1, 1), jnp.float32),   # current_min
        jax.ShapeDtypeStruct((1, 1), jnp.float32),   # current_max
        jax.ShapeDtypeStruct((1, 1), jnp.float32),   # max_abs used by the kernel
        jax.ShapeDtypeStruct((1, 1), jnp.float32),   # scale used by the kernel
    )
    grid_spec = pltpu.PrefetchScalarGridSpec(
        num_scalar_prefetch=1,
        grid=(2, n_blocks),
        in_specs=[pl.BlockSpec((tile_rows, L), lambda p, i, prm: (i, 0))],
        out_specs=(
            # Block index stays 0 throughout phase 0 (no writeback of unwritten
            # data); during phase 1 it tracks i, so each block is written once.
            pl.BlockSpec((tile_rows, L), lambda p, i, prm: (p * i, 0)),
            pl.BlockSpec((1, 1), lambda p, i, prm: (0, 0)),
            pl.BlockSpec((1, 1), lambda p, i, prm: (0, 0)),
            pl.BlockSpec((1, 1), lambda p, i, prm: (0, 0)),
            pl.BlockSpec((1, 1), lambda p, i, prm: (0, 0)),
        ),
        scratch_shapes=[
            pltpu.VMEM((tile_rows, L), jnp.float32),   # min accumulator
            pltpu.VMEM((tile_rows, L), jnp.float32),   # max accumulator
            pltpu.VMEM((1, 1), jnp.float32),           # max_abs carry
            pltpu.VMEM((1, 1), jnp.float32),           # scale carry
        ],
    )
    return pl.pallas_call(
        _fused_train_kernel,
        out_shape=out_shapes,
        grid_spec=grid_spec,
        compiler_params=pltpu.CompilerParams(
            dimension_semantics=("arbitrary", "arbitrary"),
            vmem_limit_bytes=vmem_limit,
        ),
    )(params, x2d)


# ---------------------------------------------------------------------------
# Eval-mode kernel: quantize only, single streaming pass
# ---------------------------------------------------------------------------
def _quant_only_kernel(params_ref, x_ref, o_ref):
    # params: [max_abs, scale, zero_point, threshold]
    max_abs = params_ref[0]
    scale = params_ref[1]
    zp = params_ref[2]
    thr = params_ref[3]
    x = x_ref[...].astype(jnp.float32)
    xc = jnp.clip(x, -max_abs, max_abs)
    q = jnp.trunc(scale * xc - zp)
    q = jnp.where((q >= -thr) & (q <= thr), 0.0, q)
    o_ref[...] = ((q + zp) / scale).astype(o_ref.dtype)


def _quant_only_forward(params, x2d, tile_rows, n_blocks, vmem_limit):
    R, L = x2d.shape
    return pl.pallas_call(
        _quant_only_kernel,
        out_shape=jax.ShapeDtypeStruct((R, L), x2d.dtype),
        grid_spec=pltpu.PrefetchScalarGridSpec(
            num_scalar_prefetch=1,
            grid=(n_blocks,),
            in_specs=[pl.BlockSpec((tile_rows, L), lambda i, prm: (i, 0))],
            out_specs=pl.BlockSpec((tile_rows, L), lambda i, prm: (i, 0)),
        ),
        compiler_params=pltpu.CompilerParams(
            dimension_semantics=("parallel",),
            vmem_limit_bytes=vmem_limit,
        ),
    )(params, x2d)


# ---------------------------------------------------------------------------
# Module wrapper (forward semantics of the PyTorch FakeSpikeQuantization)
# ---------------------------------------------------------------------------
class FakeSpikeQuantization:
    def __init__(self, num_bits=8, threshold=0, ema_momentum=0.1):
        self.num_bits = num_bits
        self.threshold = float(threshold)
        self.ema_momentum = jnp.float32(ema_momentum)
        self.tracked_min_biased = jnp.zeros((), jnp.float32)
        self.tracked_min = jnp.zeros((), jnp.float32)
        self.tracked_max_biased = jnp.zeros((), jnp.float32)
        self.tracked_max = jnp.zeros((), jnp.float32)
        self.iter_count = jnp.zeros((), jnp.float32)
        self.scale = jnp.ones((), jnp.float32)
        self.zero_point = jnp.zeros((), jnp.float32)
        self.training = True
        self._tile_bytes, self._vmem_limit = _hw_config()

    def __call__(self, x):
        # NOTE: buffer updates are plain Python attribute mutations; do not wrap
        # this call in jax.jit/scan if the EMA state must keep updating.
        orig_shape = x.shape
        x2d, total, tile_rows, n_blocks = _prepare_input(x, self._tile_bytes)

        if self.training:
            step = self.iter_count + 1.0
            m = self.ema_momentum
            bias_corr = (1.0 - (1.0 - m) ** step).astype(jnp.float32)
            n = jnp.float32(2 ** (self.num_bits - 1))
            n_eff = (n * jnp.float32(1.0 - 0.0001)).astype(jnp.float32)
            params = jnp.stack([
                m, bias_corr,
                self.tracked_min_biased, self.tracked_max_biased,
                n, n_eff, jnp.float32(self.threshold), self.zero_point,
            ]).astype(jnp.float32)

            out2d, cmin, cmax, kmaxabs, kscale = _fused_forward(
                params, x2d, tile_rows, n_blocks, self._vmem_limit)

            cur_min = cmin[0, 0]
            cur_max = cmax[0, 0]
            # Buffer bookkeeping (mirrors the in-kernel scalar math).
            self.iter_count = step
            self.tracked_min_biased = (
                self.tracked_min_biased * (1.0 - m) + m * cur_min)
            self.tracked_min = self.tracked_min_biased / bias_corr
            self.tracked_max_biased = (
                self.tracked_max_biased * (1.0 - m) + m * cur_max)
            self.tracked_max = self.tracked_max_biased / bias_corr
            # Store exactly the scale the kernel used.
            self.scale = kscale[0, 0]
            self.zero_point = jnp.zeros((), jnp.float32)
            self._last_max_abs = kmaxabs[0, 0]
        else:
            max_abs = jnp.maximum(jnp.abs(self.tracked_min), jnp.abs(self.tracked_max))
            params = jnp.stack([
                max_abs, self.scale, self.zero_point, jnp.float32(self.threshold)
            ]).astype(jnp.float32)
            out2d = _quant_only_forward(
                params, x2d, tile_rows, n_blocks, self._vmem_limit)

        out_flat = out2d.reshape(-1)
        if out_flat.shape[0] != total:
            out_flat = out_flat[:total]          # drop padded tail
        return out_flat.reshape(orig_shape)


# ---------------------------------------------------------------------------
# Pure-jnp reference helpers for the self-check
# ---------------------------------------------------------------------------
def _reference_scale_maxabs(x, num_bits, momentum, step):
    cmin, cmax = jnp.min(x), jnp.max(x)
    bias = 1.0 - (1.0 - momentum) ** step
    tmin = (momentum * cmin) / bias      # biased EMA starts at 0
    tmax = (momentum * cmax) / bias
    max_abs = jnp.maximum(jnp.abs(tmin), jnp.abs(tmax))
    n = jnp.float32(2 ** (num_bits - 1))
    sat = jnp.where(max_abs == 0.0, n, max_abs)
    scale = n * jnp.float32(1.0 - 0.0001) / sat
    return scale, max_abs


def _reference_quant(x, scale, max_abs, zero_point, threshold):
    xc = jnp.clip(x, -max_abs, max_abs)
    q = jnp.trunc(scale * xc - zero_point)
    q = jnp.where((q >= -threshold) & (q <= threshold), 0.0, q)
    return (q + zero_point) / scale


if __name__ == "__main__":
    key = jax.random.PRNGKey(0)
    k1, k2 = jax.random.split(key)

    # --- Test 1: training forward, lane-aligned NCHW input -----------------
    x = jax.random.normal(k1, (2, 4, 16, 16), dtype=jnp.float32)
    module = FakeSpikeQuantization(num_bits=8, threshold=1, ema_momentum=0.1)
    out = jax.block_until_ready(module(x))
    assert out.shape == x.shape and out.dtype == x.dtype

    ref_scale, ref_maxabs = _reference_scale_maxabs(
        x, 8, jnp.float32(0.1), jnp.float32(1.0))
    # (a) in-kernel EMA/scale math matches the reference formulas
    assert jnp.allclose(module.scale, ref_scale, rtol=1e-5, atol=1e-6)
    assert jnp.allclose(module._last_max_abs, ref_maxabs, rtol=1e-5, atol=1e-6)
    # (b) elementwise fake-quant matches (using the kernel's own scale so the
    #     check is not flaky at quantization-bin edges)
    ref_out = _reference_quant(x, module.scale, module._last_max_abs, 0.0, 1.0)
    assert jnp.allclose(out, ref_out, atol=1e-5, rtol=1e-5)

    # --- Test 2: training forward, non-128-aligned shape (padding path) ----
    x2 = jax.random.normal(k2, (3, 5, 7, 9), dtype=jnp.float32)
    module2 = FakeSpikeQuantization(num_bits=8, threshold=0, ema_momentum=0.1)
    out2 = jax.block_until_ready(module2(x2))
    ref_scale2, ref_maxabs2 = _reference_scale_maxabs(
        x2, 8, jnp.float32(0.1), jnp.float32(1.0))
    assert jnp.allclose(module2.scale, ref_scale2, rtol=1e-5, atol=1e-6)
    ref_out2 = _reference_quant(x2, module2.scale, module2._last_max_abs, 0.0, 0.0)
    assert out2.shape == x2.shape
    assert jnp.allclose(out2, ref_out2, atol=1e-5, rtol=1e-5)

    # --- Test 3: eval forward (uses stored buffers, quantize-only kernel) --
    module.training = False
    out_eval = jax.block_until_ready(module(x))
    max_abs_eval = jnp.maximum(jnp.abs(module.tracked_min), jnp.abs(module.tracked_max))
    ref_eval = _reference_quant(x, module.scale, max_abs_eval, module.zero_point, 1.0)
    assert jnp.allclose(out_eval, ref_eval, atol=1e-5, rtol=1e-5)

    print("KERNEL_OK")
</pallas_src>

<mosaic_0001>
module attributes {stable_mosaic.version = 11 : i64} {
  func.func @_fused_train_kernel(%arg0: i32, %arg1: i32, %arg2: memref<8xf32, #tpu.memory_space<smem>>, %arg3: memref<2x1024xf32, #tpu.memory_space<vmem>>, %arg4: memref<2x1024xf32, #tpu.memory_space<vmem>>, %arg5: memref<1x1xf32, #tpu.memory_space<vmem>>, %arg6: memref<1x1xf32, #tpu.memory_space<vmem>>, %arg7: memref<1x1xf32, #tpu.memory_space<vmem>>, %arg8: memref<1x1xf32, #tpu.memory_space<vmem>>, %arg9: memref<2x1024xf32, #tpu.memory_space<vmem>>, %arg10: memref<2x1024xf32, #tpu.memory_space<vmem>>, %arg11: memref<1x1xf32, #tpu.memory_space<vmem>>, %arg12: memref<1x1xf32, #tpu.memory_space<vmem>>) attributes {dimension_semantics = [#tpu.dimension_semantics<arbitrary>, #tpu.dimension_semantics<arbitrary>], iteration_bounds = array<i64: 2, 1>, scalar_prefetch = 1 : i64, scratch_operands = 4 : i64, tpu.core_type = #tpu.core_type<tc>, window_params = [{transform_indices = @transform_0, window_bounds = array<i64: 2, 1024>}, {transform_indices = @transform_1, window_bounds = array<i64: 2, 1024>}, {pipeline_mode = #tpu.pipeline_mode<synchronous>, transform_indices = @transform_2, window_bounds = array<i64: 1, 1>}, {pipeline_mode = #tpu.pipeline_mode<synchronous>, transform_indices = @transform_3, window_bounds = array<i64: 1, 1>}, {pipeline_mode = #tpu.pipeline_mode<synchronous>, transform_indices = @transform_4, window_bounds = array<i64: 1, 1>}, {pipeline_mode = #tpu.pipeline_mode<synchronous>, transform_indices = @transform_5, window_bounds = array<i64: 1, 1>}]} {
    %c0_i32 = arith.constant 0 : i32
    %0 = arith.cmpi eq, %arg0, %c0_i32 : i32
    %1 = arith.extui %0 : i1 to i32
    %c0_i32_0 = arith.constant 0 : i32
    %2 = arith.cmpi ne, %1, %c0_i32_0 : i32
    scf.if %2 {
      %c0_i32_2 = arith.constant 0 : i32
      %6 = arith.cmpi eq, %arg1, %c0_i32_2 : i32
      %7 = arith.extui %6 : i1 to i32
      %c0_i32_3 = arith.constant 0 : i32
      %8 = arith.cmpi ne, %7, %c0_i32_3 : i32
      scf.if %8 {
        %cst = arith.constant 0x7F800000 : f32
        %19 = vector.broadcast %cst : f32 to vector<2x1024xf32>
        %c0_15 = arith.constant 0 : index
        %c0_16 = arith.constant 0 : index
        %20 = vector.load %arg9[%c0_15, %c0_16] : memref<2x1024xf32, #tpu.memory_space<vmem>>, vector<2x1024xf32>
        tpu.vector_store %arg9[%c0_15, %c0_16], %19 {strides = array<i32>} : memref<2x1024xf32, #tpu.memory_space<vmem>>, vector<2x1024xf32>,
        %cst_17 = arith.constant 0xFF800000 : f32
        %21 = vector.broadcast %cst_17 : f32 to vector<2x1024xf32>
        %c0_18 = arith.constant 0 : index
        %c0_19 = arith.constant 0 : index
        %22 = vector.load %arg10[%c0_18, %c0_19] : memref<2x1024xf32, #tpu.memory_space<vmem>>, vector<2x1024xf32>
        tpu.vector_store %arg10[%c0_18, %c0_19], %21 {strides = array<i32>} : memref<2x1024xf32, #tpu.memory_space<vmem>>, vector<2x1024xf32>,
      } else {
      }
      %c0 = arith.constant 0 : index
      %c0_4 = arith.constant 0 : index
      %9 = vector.load %arg3[%c0, %c0_4] : memref<2x1024xf32, #tpu.memory_space<vmem>>, vector<2x1024xf32>
      %c0_5 = arith.constant 0 : index
      %c0_6 = arith.constant 0 : index
      %10 = vector.load %arg9[%c0_5, %c0_6] : memref<2x1024xf32, #tpu.memory_space<vmem>>, vector<2x1024xf32>
      %11 = arith.minimumf %10, %9 : vector<2x1024xf32>
      %c0_7 = arith.constant 0 : index
      %c0_8 = arith.constant 0 : index
      %12 = vector.load %arg9[%c0_7, %c0_8] : memref<2x1024xf32, #tpu.memory_space<vmem>>, vector<2x1024xf32>
      tpu.vector_store %arg9[%c0_7, %c0_8], %11 {strides = array<i32>} : memref<2x1024xf32, #tpu.memory_space<vmem>>, vector<2x1024xf32>,
      %c0_9 = arith.constant 0 : index
      %c0_10 = arith.constant 0 : index
      %13 = vector.load %arg10[%c0_9, %c0_10] : memref<2x1024xf32, #tpu.memory_space<vmem>>, vector<2x1024xf32>
      %14 = arith.maximumf %13, %9 : vector<2x1024xf32>
      %c0_11 = arith.constant 0 : index
      %c0_12 = arith.constant 0 : index
      %15 = vector.load %arg10[%c0_11, %c0_12] : memref<2x1024xf32, #tpu.memory_space<vmem>>, vector<2x1024xf32>
      tpu.vector_store %arg10[%c0_11, %c0_12], %14 {strides = array<i32>} : memref<2x1024xf32, #tpu.memory_space<vmem>>, vector<2x1024xf32>,
      %c0_i32_13 = arith.constant 0 : i32
      %16 = arith.cmpi eq, %arg1, %c0_i32_13 : i32
      %17 = arith.extui %16 : i1 to i32
      %c0_i32_14 = arith.constant 0 : i32
      %18 = arith.cmpi ne, %17, %c0_i32_14 : i32
      scf.if %18 {
        %c0_15 = arith.constant 0 : index
        %c0_16 = arith.constant 0 : index
        %19 = vector.load %arg9[%c0_15, %c0_16] : memref<2x1024xf32, #tpu.memory_space<vmem>>, vector<2x1024xf32>
        %20 = vector.shape_cast %19 : vector<2x1024xf32> to vector<1x2x1024xf32>
        %cst = arith.constant dense<0x7F800000> : vector<1xf32>
        %21 = vector.multi_reduction <minimumf>, %20, %cst [1, 2] : vector<1x2x1024xf32> to vector<1xf32>
        %22 = vector.shape_cast %21 : vector<1xf32> to vector<1x1x1xf32>
        %23 = vector.extract %22[0, 0, 0] : f32 from vector<1x1x1xf32>
        %24 = vector.broadcast %23 : f32 to vector<1x1xf32>
        %c0_17 = arith.constant 0 : index
        %c0_18 = arith.constant 0 : index
        %25 = vector.load %arg10[%c0_17, %c0_18] : memref<2x1024xf32, #tpu.memory_space<vmem>>, vector<2x1024xf32>
        %26 = vector.shape_cast %25 : vector<2x1024xf32> to vector<1x2x1024xf32>
        %cst_19 = arith.constant dense<0xFF800000> : vector<1xf32>
        %27 = vector.multi_reduction <maximumf>, %26, %cst_19 [1, 2] : vector<1x2x1024xf32> to vector<1xf32>
        %28 = vector.shape_cast %27 : vector<1xf32> to vector<1x1x1xf32>
        %29 = vector.extract %28[0, 0, 0] : f32 from vector<1x1x1xf32>
        %30 = vector.broadcast %29 : f32 to vector<1x1xf32>
        %c0_20 = arith.constant 0 : index
        %31 = memref.load %arg2[%c0_20] : memref<8xf32, #tpu.memory_space<smem>>
        %c1 = arith.constant 1 : index
        %32 = memref.load %arg2[%c1] : memref<8xf32, #tpu.memory_space<smem>>
        %c2 = arith.constant 2 : index
        %33 = memref.load %arg2[%c2] : memref<8xf32, #tpu.memory_space<smem>>
        %cst_21 = arith.constant 1.000000e+00 : f32
        %34 = arith.subf %cst_21, %31 : f32
        %35 = arith.mulf %33, %34 : f32
        %36 = vector.broadcast %31 : f32 to vector<1x1xf32>
        %37 = arith.mulf %36, %24 : vector<1x1xf32>
        %38 = vector.broadcast %35 : f32 to vector<1x1xf32>
        %39 = arith.addf %38, %37 : vector<1x1xf32>
        %c3 = arith.constant 3 : index
        %40 = memref.load %arg2[%c3] : memref<8xf32, #tpu.memory_space<smem>>
        %cst_22 = arith.constant 1.000000e+00 : f32
        %41 = arith.subf %cst_22, %31 : f32
        %42 = arith.mulf %40, %41 : f32
        %43 = vector.broadcast %31 : f32 to vector<1x1xf32>
        %44 = arith.mulf %43, %30 : vector<1x1xf32>
        %45 = vector.broadcast %42 : f32 to vector<1x1xf32>
        %46 = arith.addf %45, %44 : vector<1x1xf32>
        %47 = vector.broadcast %32 : f32 to vector<1x1xf32>
        %48 = arith.divf %39, %47 : vector<1x1xf32>
        %49 = vector.broadcast %32 : f32 to vector<1x1xf32>
        %50 = arith.divf %46, %49 : vector<1x1xf32>
        %51 = math.absf %48 : vector<1x1xf32>
        %52 = math.absf %50 : vector<1x1xf32>
        %53 = arith.maximumf %51, %52 : vector<1x1xf32>
        %cst_23 = arith.constant 0.000000e+00 : f32
        %54 = vector.broadcast %cst_23 : f32 to vector<1x1xf32>
        %55 = arith.cmpf oeq, %53, %54 : vector<1x1xf32>
        %c4 = arith.constant 4 : index
        %56 = memref.load %arg2[%c4] : memref<8xf32, #tpu.memory_space<smem>>
        %57 = vector.broadcast %56 : f32 to vector<1x1xf32>
        %58 = arith.select %55, %57, %53 : vector<1x1xi1>, vector<1x1xf32>
        %c5 = arith.constant 5 : index
        %59 = memref.load %arg2[%c5] : memref<8xf32, #tpu.memory_space<smem>>
        %60 = vector.broadcast %59 : f32 to vector<1x1xf32>
        %61 = arith.divf %60, %58 : vector<1x1xf32>
        %c0_24 = arith.constant 0 : index
        %c0_25 = arith.constant 0 : index
        %62 = vector.load %arg5[%c0_24, %c0_25] : memref<1x1xf32, #tpu.memory_space<vmem>>, vector<1x1xf32>
        tpu.vector_store %arg5[%c0_24, %c0_25], %24 {strides = array<i32>} : memref<1x1xf32, #tpu.memory_space<vmem>>, vector<1x1xf32>,
        %c0_26 = arith.constant 0 : index
        %c0_27 = arith.constant 0 : index
        %63 = vector.load %arg6[%c0_26, %c0_27] : memref<1x1xf32, #tpu.memory_space<vmem>>, vector<1x1xf32>
        tpu.vector_store %arg6[%c0_26, %c0_27], %30 {strides = array<i32>} : memref<1x1xf32, #tpu.memory_space<vmem>>, vector<1x1xf32>,
        %c0_28 = arith.constant 0 : index
        %c0_29 = arith.constant 0 : index
        %64 = vector.load %arg7[%c0_28, %c0_29] : memref<1x1xf32, #tpu.memory_space<vmem>>, vector<1x1xf32>
        tpu.vector_store %arg7[%c0_28, %c0_29], %53 {strides = array<i32>} : memref<1x1xf32, #tpu.memory_space<vmem>>, vector<1x1xf32>,
        %c0_30 = arith.constant 0 : index
        %c0_31 = arith.constant 0 : index
        %65 = vector.load %arg8[%c0_30, %c0_31] : memref<1x1xf32, #tpu.memory_space<vmem>>, vector<1x1xf32>
        tpu.vector_store %arg8[%c0_30, %c0_31], %61 {strides = array<i32>} : memref<1x1xf32, #tpu.memory_space<vmem>>, vector<1x1xf32>,
        %c0_32 = arith.constant 0 : index
        %c0_33 = arith.constant 0 : index
        %66 = vector.load %arg11[%c0_32, %c0_33] : memref<1x1xf32, #tpu.memory_space<vmem>>, vector<1x1xf32>
        tpu.vector_store %arg11[%c0_32, %c0_33], %53 {strides = array<i32>} : memref<1x1xf32, #tpu.memory_space<vmem>>, vector<1x1xf32>,
        %c0_34 = arith.constant 0 : index
        %c0_35 = arith.constant 0 : index
        %67 = vector.load %arg12[%c0_34, %c0_35] : memref<1x1xf32, #tpu.memory_space<vmem>>, vector<1x1xf32>
        tpu.vector_store %arg12[%c0_34, %c0_35], %61 {strides = array<i32>} : memref<1x1xf32, #tpu.memory_space<vmem>>, vector<1x1xf32>,
      } else {
      }
    } else {
    }
    %c1_i32 = arith.constant 1 : i32
    %3 = arith.cmpi eq, %arg0, %c1_i32 : i32
    %4 = arith.extui %3 : i1 to i32
    %c0_i32_1 = arith.constant 0 : i32
    %5 = arith.cmpi ne, %4, %c0_i32_1 : i32
    scf.if %5 {
      %c0 = arith.constant 0 : index
      %c0_2 = arith.constant 0 : index
      %6 = vector.load %arg11[%c0, %c0_2] : memref<1x1xf32, #tpu.memory_space<vmem>>, vector<1x1xf32>
      %c0_3 = arith.constant 0 : index
      %c0_4 = arith.constant 0 : index
      %7 = vector.load %arg12[%c0_3, %c0_4] : memref<1x1xf32, #tpu.memory_space<vmem>>, vector<1x1xf32>
      %c6 = arith.constant 6 : index
      %8 = memref.load %arg2[%c6] : memref<8xf32, #tpu.memory_space<smem>>
      %c7 = arith.constant 7 : index
      %9 = memref.load %arg2[%c7] : memref<8xf32, #tpu.memory_space<smem>>
      %c0_5 = arith.constant 0 : index
      %c0_6 = arith.constant 0 : index
      %10 = vector.load %arg3[%c0_5, %c0_6] : memref<2x1024xf32, #tpu.memory_space<vmem>>, vector<2x1024xf32>
      %cst = arith.constant 0.000000e+00 : f32
      %11 = vector.broadcast %cst : f32 to vector<1x1xf32>
      %12 = arith.subf %11, %6 : vector<1x1xf32>
      %13 = vector.broadcast %12 : vector<1x1xf32> to vector<2x1024xf32>
      %14 = arith.maximumf %13, %10 : vector<2x1024xf32>
      %15 = vector.broadcast %6 : vector<1x1xf32> to vector<2x1024xf32>
      %16 = arith.minimumf %15, %14 : vector<2x1024xf32>
      %17 = vector.broadcast %7 : vector<1x1xf32> to vector<2x1024xf32>
      %18 = arith.mulf %17, %16 : vector<2x1024xf32>
      %19 = vector.broadcast %9 : f32 to vector<2x1024xf32>
      %20 = arith.subf %18, %19 : vector<2x1024xf32>
      %cst_7 = arith.constant 0.000000e+00 : f32
      %21 = vector.broadcast %cst_7 : f32 to vector<2x1024xf32>
      %22 = arith.cmpf olt, %20, %21 : vector<2x1024xf32>
      %23 = math.ceil %20 : vector<2x1024xf32>
      %24 = math.floor %20 : vector<2x1024xf32>
      %25 = arith.select %22, %23, %24 : vector<2x1024xi1>, vector<2x1024xf32>
      %cst_8 = arith.constant 0.000000e+00 : f32
      %26 = arith.subf %cst_8, %8 : f32
      %27 = vector.broadcast %26 : f32 to vector<2x1024xf32>
      %28 = arith.cmpf oge, %25, %27 : vector<2x1024xf32>
      %29 = vector.broadcast %8 : f32 to vector<2x1024xf32>
      %30 = arith.cmpf ole, %25, %29 : vector<2x1024xf32>
      %31 = arith.andi %28, %30 : vector<2x1024xi1>
      %cst_9 = arith.constant 0.000000e+00 : f32
      %32 = vector.broadcast %cst_9 : f32 to vector<2x1024xf32>
      %33 = arith.select %31, %32, %25 : vector<2x1024xi1>, vector<2x1024xf32>
      %34 = vector.broadcast %9 : f32 to vector<2x1024xf32>
      %35 = arith.addf %33, %34 : vector<2x1024xf32>
      %36 = vector.broadcast %7 : vector<1x1xf32> to vector<2x1024xf32>
      %37 = arith.divf %35, %36 : vector<2x1024xf32>
      %c0_10 = arith.constant 0 : index
      %c0_11 = arith.constant 0 : index
      %38 = vector.load %arg4[%c0_10, %c0_11] : memref<2x1024xf32, #tpu.memory_space<vmem>>, vector<2x1024xf32>
      tpu.vector_store %arg4[%c0_10, %c0_11], %37 {strides = array<i32>} : memref<2x1024xf32, #tpu.memory_space<vmem>>, vector<2x1024xf32>,
    } else {
    }
    return
  }
  func.func @transform_0(%arg0: i32, %arg1: i32, %arg2: memref<8xf32, #tpu.memory_space<smem>>) -> (i32, i32) {
    %c0_i32 = arith.constant 0 : i32
    %c0_i32_0 = arith.constant 0 : i32
    return %arg1, %c0_i32 : i32, i32
  }
  func.func @transform_1(%arg0: i32, %arg1: i32, %arg2: memref<8xf32, #tpu.memory_space<smem>>) -> (i32, i32) {
    %0 = arith.muli %arg0, %arg1 : i32
    %c0_i32 = arith.constant 0 : i32
    %c0_i32_0 = arith.constant 0 : i32
    return %0, %c0_i32 : i32, i32
  }
  func.func @transform_2(%arg0: i32, %arg1: i32, %arg2: memref<8xf32, #tpu.memory_space<smem>>) -> (i32, i32) {
    %c0_i32 = arith.constant 0 : i32
    %c0_i32_0 = arith.constant 0 : i32
    %c0_i32_1 = arith.constant 0 : i32
    return %c0_i32, %c0_i32_0 : i32, i32
  }
  func.func @transform_3(%arg0: i32, %arg1: i32, %arg2: memref<8xf32, #tpu.memory_space<smem>>) -> (i32, i32) {
    %c0_i32 = arith.constant 0 : i32
    %c0_i32_0 = arith.constant 0 : i32
    %c0_i32_1 = arith.constant 0 : i32
    return %c0_i32, %c0_i32_0 : i32, i32
  }
  func.func @transform_4(%arg0: i32, %arg1: i32, %arg2: memref<8xf32, #tpu.memory_space<smem>>) -> (i32, i32) {
    %c0_i32 = arith.constant 0 : i32
    %c0_i32_0 = arith.constant 0 : i32
    %c0_i32_1 = arith.constant 0 : i32
    return %c0_i32, %c0_i32_0 : i32, i32
  }
  func.func @transform_5(%arg0: i32, %arg1: i32, %arg2: memref<8xf32, #tpu.memory_space<smem>>) -> (i32, i32) {
    %c0_i32 = arith.constant 0 : i32
    %c0_i32_0 = arith.constant 0 : i32
    %c0_i32_1 = arith.constant 0 : i32
    return %c0_i32, %c0_i32_0 : i32, i32
  }
}

</mosaic_0001>

<bundles_post_ra>
// kernel: tpu_custom_call.1
= control target key start
LH: loop header
LB: loop body
LE: loop exit
PB: predicated region body
PF: predicated region fallthrough
CT: control target
= control target key end

     0   :  { %s1283_s0 = inlined_call_operand.hbm [shape: f32[8], index: 0, kind: input, shape index: {}]   ;;  %s1284_s1 = inlined_call_operand.hbm [shape: f32[2,1024], index: 1, kind: input, shape index: {}]   ;;  %s1285_s2 = inlined_call_operand.hbm [shape: f32[2,1024], index: 2, kind: output, shape index: {0}]   ;;  %s1286_s3 = inlined_call_operand.hbm [shape: f32[1,1], index: 3, kind: output, shape index: {1}]   ;;  %s1287_s4 = inlined_call_operand.hbm [shape: f32[1,1], index: 4, kind: output, shape index: {2}]   ;;  %s1288_s5 = inlined_call_operand.hbm [shape: f32[1,1], index: 5, kind: output, shape index: {3}]   ;;  %s1289_s6 = inlined_call_operand.hbm [shape: f32[1,1], index: 6, kind: output, shape index: {4}]  }
   0x1   :  { %s807_s23 = scalar_lea.hbm %s1283_s0, 16 }
   0x2   :  { %p808_p0 = scmp.ne.s32.totalorder %s1283_s0, %s807_s23  ;;  %p811_p1 = scmp.lt.u32.totalorder %s807_s23, %s1283_s0 }
   0x4   :  { %p813_p2 = pnand %p811_p1, %p808_p0 }
   0x6   :  { %816 = shalt.err (!%p813_p2)  }
   0x7   :  { %s1017_s28 = smov [#allocation7]  }
   0x8   :  { %13 = dma.hbm_to_smem %s1283_s0, 16, %s1017_s28, [#allocation6] }
   0x9   :  { %987 = dma.done.wait [#allocation6], 16 }
   0xa   :  { %988 = vsyncadd [#allocation6], 4294967280 }
   0xb   :  { %15 = sfence }
   0xc   :  { %16 = vsyncpa [#allocation9], 0 }
   0xd   :  { %17 = vsyncpa [#allocation10], 0 }
   0xe   :  { %19 = vsyncpa [#allocation10 + $0x1], 0 }
   0xf   :  { %20 = vsyncpa [#allocation13], 0 }
  0x10   :  { %21 = vsyncpa [#allocation16], 0  ;;  %s1073_s7 = smov 0   ;;  %s1075_s8 = smov 0  }
  0x11   :  { %s1077_s9 = smov 0  }
  0x12 LB: > { %s687_s0 = sadd.s32 4294967295, %s1015_s9   ;;  %s688_s10 = sadd.s32 4294967294, %s1015_s9   ;;  %s1015_s9 = sphi %s1077_s9, %s27_s9   ;;  %s1011_s8 = sphi %s1075_s8, %s1300_s8   ;;  %s1007_s7 = sphi %s1073_s7, %s1299_s7  }
  0x13   : > { %s39_s11 = sadd.s32 1, %s1011_s8  ;;  %p689_p3 = scmp.ge.s32.totalorder %s1015_s9, 1 }
  0x14   : > { %p41_p4 = scmp.ge.s32.totalorder %s39_s11, 2  ;;  %p182_p5 = scmp.lt.s32.totalorder %s1015_s9, 3 }
  0x15   : > { %p1095_p6 = scmp.eq.s32.totalorder %s687_s0, 0  ;;  %s1018_s14 = smov [#allocation8]  }
  0x16   : > { %s1302_s11 = smov (%p41_p4, %s39_s11), 0  ;;  %p1101_p7 = pnand %p689_p3, %p182_p5 }
  0x17   : > { %s1293_s12 = scalar_select %p1095_p6, 1, 0 }
  0x18   : > { %s1294_s13 = scalar_select %p1101_p7, 1, 0 }
  0x19   : > { %s198_s15 = sshll.u32 %s1018_s14, 4  ;;  %p743_p8 = pneg %p1101_p7  ;;  %s199_s15 = int_to_ptr.vmem [resolvable:$true] %s198_s15 }
  0x1a   : > { %s817_s19 = scalar_lea.hbm %s1284_s1, 256 }
  0x1b   : > { %p1109_p9 = pnand %p1095_p6, %p743_p8  ;;  %p818_p10 = scmp.ne.s32.totalorder %s1284_s1, %s817_s19 }
  0x1c   : > { %p824_p0 = scmp.lt.u32.totalorder %s817_s19, %s1284_s1 }
  0x1d   : > { %p819_p11 = pneg %p1109_p9 }
  0x1f   : > { %p820_p12 = pnand %p819_p11, %p818_p10 }
  0x21   : > { %p821_p13 = pneg %p820_p12 }
  0x23   : > { %p826_p1 = pnand %p824_p0, %p821_p13 }
  0x25   : > { %829 = shalt.err (!%p826_p1)
}
  0x26   : > { %s830_s24 = scalar_lea.vmem %s199_s15, 256  ;;  %p838_p5 = scmp.lt.s32.totalorder %s199_s15, %s199_s15 }
  0x27   : > { %p831_p2 = scmp.ne.s32.totalorder %s199_s15, %s830_s24  ;;  %p839_p8 = scmp.lt.s32.totalorder %s830_s24, %s830_s24 }
  0x29   : > { %p833_p3 = pnand %p831_p2, %p819_p11  ;;  %p840_p6 = por %p839_p8, %p838_p5 }
  0x2b   : > { %p834_p4 = pneg %p833_p3 }
  0x2d   : > { %p841_p7 = pnand %p840_p6, %p834_p4 }
  0x2f   : > { %844 = shalt.err (!%p841_p7)
}
  0x30   : > { %746 = dma.hbm_to_vmem [thread:$0]  (!%p1109_p9), %s1284_s1, 256, %s199_s15, [#allocation9]  }
  0x31   : > { %p1296_p10 = scmp.ne.s32.totalorder %s1294_s13, 0 }
  0x32   : > { %p1297_p12 = scmp.ne.s32.totalorder (!%p1296_p10), %s1293_s12, 0 }
  0x33   : > { %211 = sbr.rel (%p1296_p10) target bundleno = 589 (0x24d), region = 24 }
  0x3a   : > { %990 = dma.done.wait (%p1297_p12), [#allocation9], 256  }
  0x3b   : > { %992 = vsyncadd (%p1297_p12), [#allocation9], 4294967040  ;;  %p693_p11 = scmp.ne.s32.totalorder %s1007_s7, 0 }
  0x3c   : > { %v247_v0 = vld [vmem:[#allocation8] sm:$0xff] (!%p693_p11)  ;;  %v248_v1 = vld [vmem:[#allocation8 + $0x8] sm:$0xff] (!%p693_p11)  ;;  %v272_v2 = vlaneseq (!%p693_p11)  ;;  %v1019_v3 = vmov (!%p693_p11), 1983009808   ;;  %vm310_vm0 = vcmask (!%p693_p11), 1041408   ;;  %s694_s27 = sld [smem:[#allocation7 + $0x1]] (!%p693_p11) }
  0x3d   : > { %238 = sbr.rel (%p693_p11) target bundleno = 314 (0x13a), region = 32  ;;  %v270_v4 = vunpack.c.l.s4 (!%p693_p11), %v1019_v3  ;;  %v268_v6 = vcombine.high (!%p693_p11), %v247_v0, %v247_v0  ;;  %v285_v8 = vcombine.high (!%p693_p11), %v248_v1, %v248_v1  ;;  %s407_s28 = sld [smem:[#allocation7]] (!%p693_p11)  ;;  %vm436_vm1 = vcmask (!%p693_p11), 0  }
  0x3e   : > { %v273_v5 = vshrl.u32 (!%p693_p11), %v272_v2, 7  ;;  %s695_s29 = sld [smem:[#allocation7 + $0x2]] (!%p693_p11)  ;;  %s696_s12 = sld [smem:[#allocation7 + $0x3]] (!%p693_p11) }
  0x3f   : > { %v271_v7 = vunpack.c.0.s8 (!%p693_p11), %v270_v4  ;;  %s697_s17 = sld [smem:[#allocation7 + $0x4]] (!%p693_p11)  ;;  %s698_s18 = sld [smem:[#allocation7 + $0x5]] (!%p693_p11) }
  0x41   : > { %v274_v9 = vsub.s32 (!%p693_p11), %v271_v7, %v273_v5 }
  0x42   : > { %v421_v62 = vstv (!%p693_p11), %s694_s27 }
  0x43   : > { %v275_v10 = vrot.slane (!%p693_p11), %v247_v0, %v274_v9  ;;  %v282_v11 = vrot.slane (!%p693_p11), %v268_v6, %v274_v9  ;;  %v292_v12 = vrot.slane (!%p693_p11), %v248_v1, %v274_v9  ;;  %v299_v13 = vrot.slane (!%p693_p11), %v285_v8, %v274_v9  ;;  %s410_s30 = ssub.f32 (!%p693_p11), 1.0, %s407_s28 }
  0x44   : > { %799 = vrcp.f32 %v421_v62  ;;  %v412_v63 = vstv %s407_s28 }
  0x45   : > { %v283_v14 = vcombine.high %v275_v10, %v275_v10  ;;  %v284_v15 = vcombine.high %v282_v11, %v282_v11  ;;  %v300_v16 = vcombine.high %v292_v12, %v292_v12  ;;  %v301_v17 = vcombine.high %v299_v13, %v299_v13  ;;  %s411_s13 = smul.f32 %s695_s29, %s410_s30 }
  0x46   : > { %v311_v18 = vsel %vm310_vm0, %v275_v10, inf  ;;  %v313_v19 = vsel %vm310_vm0, %v282_v11, inf  ;;  %v315_v20 = vsel %vm310_vm0, %v292_v12, inf  ;;  %v319_v21 = vsel %vm310_vm0, %v299_v13, inf  ;;  %s417_s15 = smul.f32 %s696_s12, %s410_s30 }
  0x47   : > { %v312_v22 = vsel %vm310_vm0, %v283_v14, inf  ;;  %v314_v23 = vsel %vm310_vm0, %v284_v15, inf  ;;  %v316_v24 = vmin.f32 %v311_v18, %v315_v20  ;;  %v317_v25 = vsel %vm310_vm0, %v300_v16, inf }
  0x48   : > { %v318_v26 = vmin.f32 %v312_v22, %v317_v25  ;;  %v320_v27 = vmin.f32 %v313_v19, %v319_v21  ;;  %v321_v28 = vsel %vm310_vm0, %v301_v17, inf  ;;  %v382_v29 = vsel %vm310_vm0, %v275_v10, -inf }
  0x49   : > { %v322_v30 = vmin.f32 %v314_v23, %v321_v28  ;;  %v383_v31 = vsel %vm310_vm0, %v283_v14, -inf  ;;  %v384_v32 = vsel %vm310_vm0, %v282_v11, -inf  ;;  %v385_v33 = vsel %vm310_vm0, %v284_v15, -inf }
  0x4a   : > { %v323_v34 = vmin.f32 %v316_v24, %v318_v26  ;;  %v386_v35 = vsel %vm310_vm0, %v292_v12, -inf  ;;  %v388_v36 = vsel %vm310_vm0, %v300_v16, -inf  ;;  %v390_v37 = vsel %vm310_vm0, %v299_v13, -inf }
  0x4b   : > { %v324_v38 = vmin.f32 %v320_v27, %v322_v30  ;;  %v387_v39 = vmax.f32 %v382_v29, %v386_v35  ;;  %v389_v40 = vmax.f32 %v383_v31, %v388_v36  ;;  %v391_v41 = vmax.f32 %v384_v32, %v390_v37 }
  0x4c   : > { %v392_v42 = vsel %vm310_vm0, %v301_v17, -inf  ;;  %v414_v1 = vstv %s411_s13  ;;  %v419_v6 = vstv %s417_s15  ;;  %v430_v14 = vstv %s697_s17 }
  0x4d   : > { %v325_v43 = vmin.f32 %v323_v34, %v324_v38  ;;  %v393_v44 = vmax.f32 %v385_v33, %v392_v42  ;;  %v394_v45 = vmax.f32 %v387_v39, %v389_v40  ;;  %v433_v16 = vstv %s698_s18 }
  0x4e   : > { %v800_v4 = vpop.eup %799 }
  0x4f   : > { %326 = vmin.xlane.f32.xlu0 %v325_v43  ;;  %v395_v46 = vmax.f32 %v391_v41, %v393_v44 }
  0x51   : > { %v396_v47 = vmax.f32 %v394_v45, %v395_v46 }
  0x53   : > { %397 = vmax.xlane.f32.xlu0 %v396_v47 }
  0xdc   : > { %v327_v48 = vpop.xlane.xlu0 %326 }
  0xdd   : > { %v328_v49 = vrot.slane %v327_v48, 4 }
  0xdf   : > { %v329_v50 = vmin.f32 %v327_v48, %v328_v49 }
  0xe0   : > { %v398_v51 = vpop.xlane.xlu0 %397 }
  0xe1   : > { %v330_v52 = vrot.slane %v329_v50, 2  ;;  %v399_v53 = vrot.slane %v398_v51, 4 }
  0xe3   : > { %v400_v54 = vmax.f32 %v398_v51, %v399_v53  ;;  %v331_v55 = vmin.f32 %v329_v50, %v330_v52 }
  0xe5   : > { %v401_v56 = vrot.slane %v400_v54, 2  ;;  %v332_v57 = vrot.slane %v331_v55, 1 }
  0xe7   : > { %v402_v58 = vmax.f32 %v400_v54, %v401_v56  ;;  %v333_v59 = vmin.f32 %v331_v55, %v332_v57 }
  0xe9   : > { %715 = vpush %v333_v59  ;;  %v403_v60 = vrot.slane %v402_v58, 1 }
  0xeb   : > { %v404_v61 = vmax.f32 %v402_v58, %v403_v60 }
  0xed   : > { %717 = vpush %v404_v61 }
 0x11a   : > { %s716_s14 = spop %715 }
 0x11b   : > { %v335_v0 = vstv %s716_s14 }
 0x11c   : > { %v413_v2 = vmul.f32 %v412_v63, %v335_v0  ;;  %437 = vst.msk [vmem:[#allocation12] sm:$0x1] %vm436_vm1, %v335_v0 }
 0x11e   : > { %v415_v3 = vadd.f32 %v414_v1, %v413_v2  ;;  %s718_s16 = spop %717 }
 0x11f   : > { %v406_v5 = vstv %s718_s16 }
 0x120   : > { %v418_v7 = vmul.f32 %v412_v63, %v406_v5  ;;  %438 = vst.msk [vmem:[#allocation14] sm:$0x1] %vm436_vm1, %v406_v5  ;;  %v423_v8 = vmul.f32 %v800_v4, %v415_v3 }
 0x122   : > { %v420_v9 = vadd.f32 %v419_v6, %v418_v7  ;;  %v425_v11 = vand.u32 2147483647, %v423_v8 }
 0x124   : > { %v424_v10 = vmul.f32 %v800_v4, %v420_v9 }
 0x126   : > { %v426_v12 = vand.u32 2147483647, %v424_v10 }
 0x128   : > { %v427_v13 = vmax.f32.f32 %v425_v11, %v426_v12 }
 0x12a   : > { %vm428_vm2 = vcmp.eq.f32.partialorder %v427_v13, 0.0  ;;  %439 = vst.msk [vmem:[#allocation15] sm:$0x1] %vm436_vm1, %v427_v13  ;;  %441 = vst.msk [vmem:[#allocation4] sm:$0x1] %vm436_vm1, %v427_v13 }
 0x12b   : > { %v431_v15 = vsel %vm428_vm2, %v430_v14, %v427_v13 }
 0x12c   : > { %801 = vrcp.f32 %v431_v15 }
 0x136   : > { %v802_v17 = vpop.eup %801 }
 0x137   : > { %v435_v18 = vmul.f32 %v802_v17, %v433_v16 }
 0x139   : > { %440 = vst.msk [vmem:[#allocation17] sm:$0x1] %vm436_vm1, %v435_v18  ;;  %442 = vst.msk [vmem:[#allocation5] sm:$0x1] %vm436_vm1, %v435_v18 }
 0x13a PF: > { %p699_p6 = scmp.ne.s32.totalorder %s1007_s7, 1 }
 0x13b   : > { %v447_v19 = vld [vmem:[#allocation4] sm:$0x1] (!%p699_p6)  ;;  %v455_v20 = vlaneseq (!%p699_p6)  ;;  %v1020_v22 = vmov (!%p699_p6), 0   ;;  %s701_s19 = sld [smem:[#allocation7 + $0x7]] (!%p699_p6)  ;;  %v451_v28 = vld [vmem:[#allocation8] sm:$0xff] (!%p699_p6)  ;;  %v452_v29 = vld [vmem:[#allocation8 + $0x8] sm:$0xff] (!%p699_p6) }
 0x13c   : > { %446 = sbr.rel (%p699_p6) target bundleno = 474 (0x1da), region = 44  ;;  %803 = vset.pattern.permute.xlu0 (!%p699_p6), %v1020_v22  ;;  %804 = vset.pattern.permute.xlu1 (!%p699_p6), %v1020_v22  ;;  %v453_v23 = vsub.f32 (!%p699_p6), 0.0, %v447_v19  ;;  %s700_s7 = sld [smem:[#allocation7 + $0x6]] (!%p699_p6) }
 0x13d   : > { %v456_v24 = vshrl.u32 (!%p699_p6), %v455_v20, 7 }
 0x13f   : > { %v457_v25 = vsub.s32 (!%p699_p6), 0, %v456_v24 }
 0x140   : > { %v702_v21 = vld [vmem:[#allocation5] ss:$0 sm:$0xff] (!%p699_p6) }
 0x141   : > { %482 = vperm.xlu1 (!%p699_p6), %804, %v702_v21   ;;  %v458_v26 = vrot.slane (!%p699_p6), %v453_v23, %v457_v25  ;;  %v469_v27 = vrot.slane (!%p699_p6), %v447_v19, %v457_v25  ;;  %v487_v37 = vstv (!%p699_p6), %s701_s19 }
 0x142   : > { %s498_s20 = ssub.f32 (!%p699_p6), 0.0, %s700_s7  ;;  %v502_v45 = vstv (!%p699_p6), %s700_s7 }
 0x143   : > { %460 = vperm.xlu0 %803, %v458_v26  }
 0x144   : > { %v499_v44 = vstv %s498_s20 }
 0x147   : > { %471 = vperm.xlu0 %803, %v469_v27  }
 0x1c0   : > { %v483_v34 = vpop.permute.xlu1 %482 }
 0x1c1   : > { %805 = vrcp.f32 %v483_v34 }
 0x1c2   : > { %v461_v30 = vpop.permute.xlu0 %460 }
 0x1c3   : > { %v463_v31 = vmax.f32 %v461_v30, %v451_v28  ;;  %v464_v32 = vmax.f32 %v461_v30, %v452_v29 }
 0x1c6   : > { %v472_v33 = vpop.permute.xlu0 %471 }
 0x1c7   : > { %v474_v35 = vmin.f32 %v472_v33, %v463_v31  ;;  %v475_v36 = vmin.f32 %v472_v33, %v464_v32 }
 0x1c9   : > { %v485_v38 = vmul.f32 %v483_v34, %v474_v35  ;;  %v486_v39 = vmul.f32 %v483_v34, %v475_v36 }
 0x1cb   : > { %v488_v40 = vsub.f32 %v485_v38, %v487_v37  ;;  %v489_v41 = vsub.f32 %v486_v39, %v487_v37  ;;  %v806_v50 = vpop.eup %805 }
 0x1cd   : > { %vm490_vm3 = vcmp.lt.f32.partialorder %v488_v40, 0.0  ;;  %vm491_vm4 = vcmp.lt.f32.partialorder %v489_v41, 0.0  ;;  %v492_v42 = vceil.f32 %v488_v40  ;;  %v493_v43 = vceil.f32 %v489_v41 }
 0x1ce   : > { %v494_v46 = vfloor.f32 %v488_v40  ;;  %v495_v47 = vfloor.f32 %v489_v41 }
 0x1d0   : > { %v496_v48 = vsel %vm490_vm3, %v492_v42, %v494_v46  ;;  %v497_v49 = vsel %vm491_vm4, %v493_v43, %v495_v47 }
 0x1d1   : > { %vm500_vm5 = vcmp.ge.f32.partialorder %v496_v48, %v499_v44  ;;  %vm501_vm6 = vcmp.ge.f32.partialorder %v497_v49, %v499_v44  ;;  %vm503_vm7 = vcmp.le.f32.partialorder %v496_v48, %v502_v45  ;;  %vm504_vm8 = vcmp.le.f32.partialorder %v497_v49, %v502_v45 }
 0x1d2   : > { %vm505_vm9 = vmand %vm500_vm5, %vm503_vm7 }
 0x1d3   : > { %vm506_vm10 = vmand %vm501_vm6, %vm504_vm8  ;;  %v507_v51 = vsel %vm505_vm9, 0.0, %v496_v48 }
 0x1d4   : > { %v508_v52 = vsel %vm506_vm10, 0.0, %v497_v49  ;;  %v509_v53 = vadd.f32 %v507_v51, %v487_v37 }
 0x1d5   : > { %v510_v54 = vadd.f32 %v508_v52, %v487_v37 }
 0x1d6   : > { %v512_v55 = vmul.f32 %v806_v50, %v509_v53 }
 0x1d7   : > { %v513_v56 = vmul.f32 %v806_v50, %v510_v54 }
 0x1d8   : > { %514 = vst [vmem:[#allocation11] sm:$0xff] %v512_v55 }
 0x1d9   : > { %515 = vst [vmem:[#allocation11 + $0x8] sm:$0xff] %v513_v56 }
 0x1da PF: > { %p1161_p7 = scmp.eq.s32.totalorder %s687_s0, 1  ;;  %s1021_s22 = smov [#allocation12]  }
 0x1db   : > { %s543_s23 = sshll.u32 %s1021_s22, 4  ;;  %s1022_s24 = smov [#allocation15]   ;;  %s544_s23 = int_to_ptr.vmem [resolvable:$true] %s543_s23 }
 0x1dc   : > { %s565_s25 = sshll.u32 %s1022_s24, 4  ;;  %s845_s26 = scalar_lea.vmem %s544_s23, 16  ;;  %s566_s25 = int_to_ptr.vmem [resolvable:$true] %s565_s25 }
 0x1dd   : > { %p846_p9 = scmp.ne.s32.totalorder %s544_s23, %s845_s26  ;;  %s851_s27 = scalar_lea.vmem %s544_s23, 32 }
 0x1de   : > { %p852_p1 = scmp.lt.s32.totalorder %s544_s23, %s544_s23  ;;  %p853_p2 = scmp.lt.s32.totalorder %s851_s27, %s845_s26 }
 0x1df   : > { %p847_p13 = pnand %p846_p9, %p1161_p7 }
 0x1e0   : > { %p854_p3 = por %p853_p2, %p852_p1 }
 0x1e1   : > { %p848_p0 = pneg %p847_p13 }
 0x1e3   : > { %p855_p4 = pnand %p854_p3, %p848_p0 }
 0x1e5   : > { %858 = shalt.err (!%p855_p4)
}
 0x1e6   : > { %s859_s29 = scalar_lea.hbm %s1286_s3, 16 }
 0x1e7   : > { %p860_p5 = scmp.ne.s32.totalorder %s1286_s3, %s859_s29  ;;  %p865_p12 = scmp.lt.u32.totalorder %s859_s29, %s1286_s3 }
 0x1e9   : > { %p861_p8 = pnand %p860_p5, %p1161_p7 }
 0x1eb   : > { %p862_p10 = pneg %p861_p8 }
 0x1ed   : > { %p867_p11 = pnand %p865_p12, %p862_p10 }
 0x1ef   : > { %870 = shalt.err (!%p867_p11)
}
 0x1f0   : > { %726 = dma.vmem_to_hbm [thread:$0]  (%p1161_p7), %s544_s23, 16, %s1286_s3, [#allocation13]  }
 0x1f1   : > { %s871_s17 = scalar_lea.vmem %s566_s25, 16  ;;  %s877_s18 = scalar_lea.vmem %s566_s25, 32 }
 0x1f2   : > { %p872_p6 = scmp.ne.s32.totalorder %s566_s25, %s871_s17  ;;  %p878_p0 = scmp.lt.s32.totalorder %s566_s25, %s566_s25 }
 0x1f3   : > { %p879_p1 = scmp.lt.s32.totalorder %s877_s18, %s871_s17 }
 0x1f4   : > { %p873_p9 = pnand %p872_p6, %p1161_p7 }
 0x1f5   : > { %p880_p2 = por %p879_p1, %p878_p0 }
 0x1f6   : > { %p874_p13 = pneg %p873_p9 }
 0x1f8   : > { %p881_p3 = pnand %p880_p2, %p874_p13 }
 0x1fa   : > { %884 = shalt.err (!%p881_p3)
}
 0x1fb   : > { %s885_s20 = scalar_lea.hbm %s1288_s5, 16 }
 0x1fc   : > { %p886_p4 = scmp.ne.s32.totalorder %s1288_s5, %s885_s20  ;;  %p891_p10 = scmp.lt.u32.totalorder %s885_s20, %s1288_s5 }
 0x1fe   : > { %p887_p5 = pnand %p886_p4, %p1161_p7 }
 0x200   : > { %p888_p8 = pneg %p887_p5 }
 0x202   : > { %p893_p12 = pnand %p891_p10, %p888_p8 }
 0x204   : > { %896 = shalt.err (!%p893_p12)
}
 0x205   : > { %730 = dma.vmem_to_hbm [thread:$0]  (%p1161_p7), %s566_s25, 16, %s1288_s5, [#allocation16]  }
 0x206   : > { %s1023_s28 = smov [#allocation11]   ;;  %s1024_s30 = smov [#allocation14]  }
 0x207   : > { %s532_s29 = sshll.u32 %s1023_s28, 4  ;;  %s554_s12 = sshll.u32 %s1024_s30, 4  ;;  %s533_s29 = int_to_ptr.vmem [resolvable:$true] %s532_s29  ;;  %s1201_s12 = int_to_ptr.vmem [resolvable:$true] %s554_s12 }
 0x208   : > { %s897_s13 = scalar_lea.vmem %s533_s29, 256  ;;  %s903_s14 = scalar_lea.vmem %s533_s29, 512 }
 0x209   : > { %p898_p11 = scmp.ne.s32.totalorder %s533_s29, %s897_s13  ;;  %p904_p13 = scmp.lt.s32.totalorder %s533_s29, %s533_s29 }
 0x20a   : > { %p905_p0 = scmp.lt.s32.totalorder %s903_s14, %s897_s13 }
 0x20b   : > { %p899_p6 = pnand %p898_p11, %p1161_p7 }
 0x20c   : > { %p906_p1 = por %p905_p0, %p904_p13 }
 0x20d   : > { %p900_p9 = pneg %p899_p6 }
 0x20f   : > { %p907_p2 = pnand %p906_p1, %p900_p9 }
 0x211   : > { %910 = shalt.err (!%p907_p2)
}
 0x212   : > { %s911_s16 = scalar_lea.hbm %s1285_s2, 256 }
 0x213   : > { %p912_p3 = scmp.ne.s32.totalorder %s1285_s2, %s911_s16  ;;  %p917_p8 = scmp.lt.u32.totalorder %s911_s16, %s1285_s2 }
 0x215   : > { %p913_p4 = pnand %p912_p3, %p1161_p7 }
 0x217   : > { %p914_p5 = pneg %p913_p4 }
 0x219   : > { %p919_p10 = pnand %p917_p8, %p914_p5 }
 0x21b   : > { %922 = shalt.err (!%p919_p10)
}
 0x21c   : > { %724 = dma.vmem_to_hbm [thread:$0]  (%p1161_p7), %s533_s29, 256, %s1285_s2, [#allocation10]  }
 0x21d   : > { %s923_s24 = scalar_lea.vmem %s1201_s12, 16  ;;  %s929_s23 = scalar_lea.vmem %s1201_s12, 32 }
 0x21e   : > { %p924_p12 = scmp.ne.s32.totalorder %s1201_s12, %s923_s24  ;;  %p930_p9 = scmp.lt.s32.totalorder %s1201_s12, %s1201_s12 }
 0x21f   : > { %p931_p13 = scmp.lt.s32.totalorder %s929_s23, %s923_s24 }
 0x220   : > { %p925_p11 = pnand %p924_p12, %p1161_p7 }
 0x221   : > { %p932_p0 = por %p931_p13, %p930_p9 }
 0x222   : > { %p926_p6 = pneg %p925_p11 }
 0x224   : > { %p933_p1 = pnand %p932_p0, %p926_p6 }
 0x226   : > { %936 = shalt.err (!%p933_p1)
}
 0x227   : > { %s937_s0 = scalar_lea.hbm %s1287_s4, 16 }
 0x228   : > { %p938_p2 = scmp.ne.s32.totalorder %s1287_s4, %s937_s0  ;;  %p943_p5 = scmp.lt.u32.totalorder %s937_s0, %s1287_s4 }
 0x22a   : > { %p939_p3 = pnand %p938_p2, %p1161_p7 }
 0x22c   : > { %p940_p4 = pneg %p939_p3 }
 0x22e   : > { %p945_p8 = pnand %p943_p5, %p940_p4 }
 0x230   : > { %948 = shalt.err (!%p945_p8)
}
 0x231   : > { %728 = dma.vmem_to_hbm [thread:$0]  (%p1161_p7), %s1201_s12, 16, %s1287_s4, [#allocation13]  }
 0x232   : > { %s1025_s25 = smov [#allocation17]  }
 0x233   : > { %s576_s16 = sshll.u32 %s1025_s25, 4  ;;  %s577_s16 = int_to_ptr.vmem [resolvable:$true] %s576_s16 }
 0x234   : > { %s949_s17 = scalar_lea.vmem %s577_s16, 16  ;;  %s955_s18 = scalar_lea.vmem %s577_s16, 32 }
 0x235   : > { %p950_p10 = scmp.ne.s32.totalorder %s577_s16, %s949_s17  ;;  %p956_p6 = scmp.lt.s32.totalorder %s577_s16, %s577_s16 }
 0x236   : > { %p957_p9 = scmp.lt.s32.totalorder %s955_s18, %s949_s17 }
 0x237   : > { %p951_p12 = pnand %p950_p10, %p1161_p7 }
 0x238   : > { %p958_p13 = por %p957_p9, %p956_p6 }
 0x239   : > { %p952_p11 = pneg %p951_p12 }
 0x23b   : > { %p959_p0 = pnand %p958_p13, %p952_p11 }
 0x23d   : > { %962 = shalt.err (!%p959_p0)
}
 0x23e   : > { %s963_s20 = scalar_lea.hbm %s1289_s6, 16 }
 0x23f   : > { %p964_p1 = scmp.ne.s32.totalorder %s1289_s6, %s963_s20  ;;  %p969_p4 = scmp.lt.u32.totalorder %s963_s20, %s1289_s6 }
 0x241   : > { %p965_p2 = pnand %p964_p1, %p1161_p7 }
 0x243   : > { %p966_p3 = pneg %p965_p2 }
 0x245   : > { %p971_p5 = pnand %p969_p4, %p966_p3 }
 0x247   : > { %974 = shalt.err (!%p971_p5)
}
 0x248   : > { %732 = dma.vmem_to_hbm [thread:$0]  (%p1161_p7), %s577_s16, 16, %s1289_s6, [#allocation16]  }
 0x249   : > { %994 = dma.done.wait (%p1161_p7), [#allocation13], 32  }
 0x24a   : > { %996 = vsyncadd (%p1161_p7), [#allocation13], 4294967264 }
 0x24b   : > { %998 = dma.done.wait (%p1161_p7), [#allocation16], 32  }
 0x24c   : > { %1000 = vsyncadd (%p1161_p7), [#allocation16], 4294967264 }
 0x24d PF: > { %p762_p8 = scmp.ge.s32.totalorder %s1015_s9, 2  ;;  %p763_p10 = scmp.eq.s32.totalorder %s688_s10, 1 }
 0x24f   : > { %p748_p12 = pnand %p763_p10, %p762_p8 }
 0x251   : > { %1002 = dma.done.wait (!%p748_p12), [#allocation10], 256  }
 0x252   : > { %1004 = vsyncadd (!%p748_p12), [#allocation10], 4294967040  ;;  %s27_s9 = sadd.s32 1, %s1015_s9   ;;  %s1299_s7 = smov %s1011_s8 }
 0x253   : > { %p24_p11 = scmp.ge.s32.totalorder %s27_s9, 4   ;;  %s1300_s8 = smov %s1302_s11 }
 0x255   :  { %26 = sbr.rel (!%p24_p11) target bundleno = 18 (0x12), region = 110 }
 0x25c   :  { %610 = vsyncpa [#allocation9], 1 }
 0x25d   :  { %612 = vsyncpa [#allocation9 + $0x1], 1 }
 0x25e   :  { %613 = vsyncpa [#allocation10], 1 }
 0x25f   :  { %615 = vsyncpa [#allocation10 + $0x1], 1 }
 0x260   :  { %616 = vsyncpa [#allocation13], 1 }
 0x261   :  { %617 = vsyncpa [#allocation16], 1 }

</bundles_post_ra>
